<compile_context>
chip_gen: v7x
topology: tpu7x:2x2x1
jax: 0.10.0
libtpu: 0.0.40
codegen_flags: <defaults>
</compile_context>

<pallas_src>
import functools

import jax
import jax.numpy as jnp
from jax.experimental import pallas as pl
from jax.experimental.pallas import tpu as pltpu

IN_FEATURES = 1792
OUT_FEATURES = 2
DROP_P = 0.4

MAX_BATCH_TILE = 512      # rows per grid step cap (multiple of 8); ~3.5 MiB f32 / buffer
MIN_BATCH_TILE = 64       # keep per-step DMA well above the ~0.35us step overhead
TARGET_GRID_STEPS = 8     # enough steps to pipeline + megacore-shard on v7x
VMEM_LIMIT_BYTES = 32 * 1024 * 1024  # > v5e's 16 MiB default scoped limit, < v7x's 64 MiB physical


def _round_up(n, m):
    return ((n + m - 1) // m) * m


def _pick_batch_tile(batch):
    """Rows per grid step: multiple of 8 (sublane rule), or == batch for tiny batches."""
    if batch <= MIN_BATCH_TILE:
        return batch  # single full block (block_shape == array dims is always legal)
    tb = _round_up(pl.cdiv(batch, TARGET_GRID_STEPS), 8)
    return max(MIN_BATCH_TILE, min(MAX_BATCH_TILE, tb))


def _eval_kernel(x_ref, w_ref, b_ref, o_ref):
    # Linear: x @ W^T on the MXU with f32 accumulation; (1, 2) bias broadcasts.
    o_ref[...] = (
        jnp.dot(x_ref[...], w_ref[...], preferred_element_type=jnp.float32)
        + b_ref[...]
    )


def _train_kernel(x_ref, m_ref, w_ref, b_ref, o_ref):
    inv_keep = 1.0 / (1.0 - DROP_P)
    x = x_ref[...]                                # (TB, 1792), activation dtype
    keep = m_ref[...] != 0                        # int8 keep mask -> vector mask
    x = jnp.where(keep, x, jnp.zeros_like(x))     # drop; 1/(1-p) folded below
    out = jnp.dot(x, w_ref[...], preferred_element_type=jnp.float32)
    o_ref[...] = out * inv_keep + b_ref[...]      # scale only TB*2 elements


@functools.partial(jax.jit, static_argnames=("training",))
def cls_head(x, weight, bias, *, key=None, training: bool = False):
    """ClsHead forward.

    x:      (B, C, H, W) with C*H*W == 1792.  Any float dtype; passing bf16
            halves the dominant HBM stream (recommended when upstream allows).
    weight: (2, 1792) PyTorch nn.Linear layout.   bias: (2,).
    key:    jax.random key; required when training=True (dropout mask).
    """
    B = x.shape[0]
    x2d = x.reshape(B, -1)                            # flatten(start_dim=1)
    assert x2d.shape[1] == IN_FEATURES, x2d.shape
    w_t = weight.T.astype(x2d.dtype)                  # (1792, 2), match MXU operand dtype
    b2d = bias.reshape(1, OUT_FEATURES).astype(jnp.float32)

    TB = _pick_batch_tile(B)
    grid = (pl.cdiv(B, TB),)
    # NOTE: when B % TB != 0, the padded rows of the last tile read junk and
    # produce junk output rows that the masked writeback discards.  Each output
    # row depends only on its own input row, so this is correct; do not add a
    # batch-axis reduction without revisiting it.

    itemsize = jnp.dtype(x2d.dtype).itemsize
    bytes_accessed = (
        B * IN_FEATURES * itemsize                    # x (dominant stream)
        + IN_FEATURES * OUT_FEATURES * itemsize       # weight (resident)
        + OUT_FEATURES * 4                            # bias
        + B * OUT_FEATURES * 4                        # output
    )

    x_spec = pl.BlockSpec((TB, IN_FEATURES), lambda i: (i, 0))
    w_spec = pl.BlockSpec((IN_FEATURES, OUT_FEATURES), lambda i: (0, 0))
    b_spec = pl.BlockSpec((1, OUT_FEATURES), lambda i: (0, 0))
    out_spec = pl.BlockSpec((TB, OUT_FEATURES), lambda i: (i, 0))

    if training:
        if key is None:
            raise ValueError("cls_head(training=True) requires a PRNG `key`.")
        # TODO(synk): an in-kernel mask via pltpu.prng_random_bits would avoid
        # this extra HBM stream, but that primitive has no interpret/CPU
        # lowering; the int8 mask stream costs only ~25% of the f32 x stream.
        keep_mask = jax.random.bernoulli(
            key, 1.0 - DROP_P, (B, IN_FEATURES)).astype(jnp.int8)
        kernel = _train_kernel
        mask_spec = pl.BlockSpec((TB, IN_FEATURES), lambda i: (i, 0))
        in_specs = [x_spec, mask_spec, w_spec, b_spec]
        operands = (x2d, keep_mask, w_t, b2d)
        bytes_accessed += B * IN_FEATURES             # int8 mask stream
    else:
        kernel = _eval_kernel
        in_specs = [x_spec, w_spec, b_spec]
        operands = (x2d, w_t, b2d)

    cost = pl.CostEstimate(
        flops=2 * B * IN_FEATURES * OUT_FEATURES,
        transcendentals=0,
        bytes_accessed=bytes_accessed,
    )

    return pl.pallas_call(
        kernel,
        out_shape=jax.ShapeDtypeStruct((B, OUT_FEATURES), jnp.float32),
        grid=grid,
        in_specs=in_specs,
        out_specs=out_spec,
        compiler_params=pltpu.CompilerParams(
            dimension_semantics=("parallel",),        # megacore sharding on v7x
            vmem_limit_bytes=VMEM_LIMIT_BYTES,        # ~15 MiB peak @ TB=512 f32 training
        ),
        cost_estimate=cost,
    )(*operands)


def init_params(key):
    """Deterministic synthetic init matching nn.Linear(1792, 2) shapes."""
    kw, kb = jax.random.split(key)
    bound = 1.0 / (IN_FEATURES ** 0.5)  # same bound PyTorch uses for Linear
    weight = jax.random.uniform(
        kw, (OUT_FEATURES, IN_FEATURES), jnp.float32, -bound, bound)
    bias = jax.random.uniform(kb, (OUT_FEATURES,), jnp.float32, -bound, bound)
    return weight, bias


if __name__ == "__main__":
    key = jax.random.PRNGKey(0)
    k_x, k_p, k_big, k_drop = jax.random.split(key, 4)

    # Small NCHW input whose flattened feature size is 1792 (7 * 16 * 16).
    x = jax.random.normal(k_x, (2, 7, 16, 16), jnp.float32)
    weight, bias = init_params(k_p)

    # --- Eval mode (dropout == identity), matching module.eval() semantics. ---
    out = jax.block_until_ready(cls_head(x, weight, bias, training=False))
    ref = x.reshape(2, -1) @ weight.T + bias
    assert out.shape == (2, OUT_FEATURES)
    assert jnp.allclose(out, ref, atol=1e-4, rtol=1e-4), (out, ref)

    # --- Multi-step grid + partial last tile (B=96 -> TB=64, grid=(2,)). ---
    xb = jax.random.normal(k_big, (96, 7, 16, 16), jnp.float32)
    outb = jax.block_until_ready(cls_head(xb, weight, bias, training=False))
    refb = xb.reshape(96, -1) @ weight.T + bias
    assert outb.shape == (96, OUT_FEATURES)
    assert jnp.allclose(outb, refb, atol=1e-3, rtol=1e-3)

    # --- bf16 activation path (halves the dominant HBM stream). ---
    out_bf16 = jax.block_until_ready(
        cls_head(x.astype(jnp.bfloat16), weight, bias, training=False))
    assert out_bf16.shape == (2, OUT_FEATURES)
    assert bool(jnp.all(jnp.isfinite(out_bf16)))
    assert jnp.allclose(out_bf16, ref, atol=0.1, rtol=0.1), (out_bf16, ref)

    # --- Training mode (inverted dropout, mask generated with jax.random). ---
    # TODO(synk): the dropout mask stream is not bit-identical to
    # torch.nn.Dropout's RNG stream (different generators); semantics match.
    out_tr = jax.block_until_ready(
        cls_head(x, weight, bias, key=k_drop, training=True))
    assert out_tr.shape == (2, OUT_FEATURES)
    assert bool(jnp.all(jnp.isfinite(out_tr)))

    print("KERNEL_OK")
</pallas_src>

<mosaic_0001>
module attributes {stable_mosaic.version = 11 : i64} {
  func.func @_eval_kernel(%arg0: i32, %arg1: memref<2x1792xf32, #tpu.memory_space<vmem>>, %arg2: memref<1792x2xf32, #tpu.memory_space<vmem>>, %arg3: memref<1x2xf32, #tpu.memory_space<vmem>>, %arg4: memref<2x2xf32, #tpu.memory_space<vmem>>) attributes {dimension_semantics = [#tpu.dimension_semantics<parallel>], iteration_bounds = array<i64: 1>, scalar_prefetch = 0 : i64, scratch_operands = 0 : i64, tpu.core_type = #tpu.core_type<tc>, window_params = [{transform_indices = @transform_0, window_bounds = array<i64: 2, 1792>}, {pipeline_mode = #tpu.pipeline_mode<synchronous>, transform_indices = @transform_1, window_bounds = array<i64: 1792, 2>}, {pipeline_mode = #tpu.pipeline_mode<synchronous>, transform_indices = @transform_2, window_bounds = array<i64: 1, 2>}, {transform_indices = @transform_3, window_bounds = array<i64: 2, 2>}]} {
    %c0 = arith.constant 0 : index
    %c0_0 = arith.constant 0 : index
    %0 = vector.load %arg1[%c0, %c0_0] : memref<2x1792xf32, #tpu.memory_space<vmem>>, vector<2x1792xf32>
    %c0_1 = arith.constant 0 : index
    %c0_2 = arith.constant 0 : index
    %1 = vector.load %arg2[%c0_1, %c0_2] : memref<1792x2xf32, #tpu.memory_space<vmem>>, vector<1792x2xf32>
    %cst = arith.constant dense<0.000000e+00> : vector<2x2xf32>
    %2 = tpu.matmul %0, %1, %cst {dimension_numbers = #tpu.dot_dimension_numbers<[1], [0], [0], [1], [0, 0, 1, 1], [], []>} : vector<2x1792xf32>, vector<1792x2xf32>, vector<2x2xf32> -> vector<2x2xf32>
    %c0_3 = arith.constant 0 : index
    %c0_4 = arith.constant 0 : index
    %3 = vector.load %arg3[%c0_3, %c0_4] : memref<1x2xf32, #tpu.memory_space<vmem>>, vector<1x2xf32>
    %4 = vector.broadcast %3 : vector<1x2xf32> to vector<2x2xf32>
    %5 = arith.addf %2, %4 : vector<2x2xf32>
    %c0_5 = arith.constant 0 : index
    %c0_6 = arith.constant 0 : index
    %6 = vector.load %arg4[%c0_5, %c0_6] : memref<2x2xf32, #tpu.memory_space<vmem>>, vector<2x2xf32>
    tpu.vector_store %arg4[%c0_5, %c0_6], %5 {strides = array<i32>} : memref<2x2xf32, #tpu.memory_space<vmem>>, vector<2x2xf32>,
    return
  }
  func.func @transform_0(%arg0: i32) -> (i32, i32) {
    %c0_i32 = arith.constant 0 : i32
    %c0_i32_0 = arith.constant 0 : i32
    return %arg0, %c0_i32 : i32, i32
  }
  func.func @transform_1(%arg0: i32) -> (i32, i32) {
    %c0_i32 = arith.constant 0 : i32
    %c0_i32_0 = arith.constant 0 : i32
    %c0_i32_1 = arith.constant 0 : i32
    return %c0_i32, %c0_i32_0 : i32, i32
  }
  func.func @transform_2(%arg0: i32) -> (i32, i32) {
    %c0_i32 = arith.constant 0 : i32
    %c0_i32_0 = arith.constant 0 : i32
    %c0_i32_1 = arith.constant 0 : i32
    return %c0_i32, %c0_i32_0 : i32, i32
  }
  func.func @transform_3(%arg0: i32) -> (i32, i32) {
    %c0_i32 = arith.constant 0 : i32
    %c0_i32_0 = arith.constant 0 : i32
    return %arg0, %c0_i32 : i32, i32
  }
}

</mosaic_0001>

<bundles_post_ra>
// kernel: cls_head.1
= control target key start
LH: loop header
LB: loop body
LE: loop exit
PB: predicated region body
PF: predicated region fallthrough
CT: control target
= control target key end

     0   :  { %v1333_v43 = vmov 1983009808   ;;  %v258_v45 = vlaneseq  ;;  %s2087_s0 = inlined_call_operand.vmem [shape: f32[2,1792], index: 0, kind: input, shape index: {}]   ;;  %s2088_s1 = inlined_call_operand.vmem [shape: f32[1792,2], index: 1, kind: input, shape index: {}]   ;;  %s2089_s2 = inlined_call_operand.vmem [shape: f32[1,2], index: 2, kind: input, shape index: {}]   ;;  %s2090_s3 = inlined_call_operand.hbm [shape: f32[2,2], index: 3, kind: output, shape index: {}]  }
   0x1   :  { %v35_v0 = vld [vmem:[%s2088_s1 + $0x80] sm:$0xff]  ;;  %v36_v1 = vld [vmem:[%s2088_s1 + $0x88] sm:$0xff]  ;;  %v37_v11 = vld [vmem:[%s2088_s1 + $0x90] sm:$0xff]  ;;  %v256_v44 = vunpack.c.l.s4 %v1333_v43 }
   0x2   :  { %v19_v2 = vld [vmem:[%s2088_s1] sm:$0xff]  ;;  %v1080_v3 = vpack.c.bf16 %v36_v1, %v35_v0  ;;  %v20_v4 = vld [vmem:[%s2088_s1 + $0x8] sm:$0xff]  ;;  %v38_v13 = vld [vmem:[%s2088_s1 + $0x98] sm:$0xff]  ;;  %v259_v60 = vshrl.u32 %v258_v45, 7 }
   0x3   :  { %v67_v5 = vld [vmem:[%s2088_s1 + $0x180] sm:$0xff]  ;;  %v68_v6 = vld [vmem:[%s2088_s1 + $0x188] sm:$0xff]  ;;  %v1082_v7 = vpack.c.bf16 %v20_v4, %v19_v2  ;;  %v21_v14 = vld [vmem:[%s2088_s1 + $0x10] sm:$0xff]  ;;  %v1084_v16 = vpack.c.bf16 %v38_v13, %v37_v11  ;;  %v257_v59 = vunpack.c.0.s8 %v256_v44 }
   0x4   :  { %v1112_v8 = vpack.c.bf16 %v68_v6, %v67_v5  ;;  %v51_v9 = vld [vmem:[%s2088_s1 + $0x100] sm:$0xff]  ;;  %v52_v10 = vld [vmem:[%s2088_s1 + $0x108] sm:$0xff]  ;;  %1081 = vmatprep.subr.bf16.mxu0 %v1080_v3  ;;  %v22_v15 = vld [vmem:[%s2088_s1 + $0x18] sm:$0xff] }
   0x5   :  { %v1114_v12 = vpack.c.bf16 %v52_v10, %v51_v9  ;;  %1083 = vmatpush3.bf16.msra.mxu0 %v1082_v7  ;;  %v1086_v17 = vpack.c.bf16 %v22_v15, %v21_v14  ;;  %v69_v18 = vld [vmem:[%s2088_s1 + $0x190] sm:$0xff]  ;;  %v70_v19 = vld [vmem:[%s2088_s1 + $0x198] sm:$0xff]  ;;  %v39_v23 = vld [vmem:[%s2088_s1 + $0xa0] sm:$0xff]  ;;  %v1499_v10 = vsub.s32 %v257_v59, %v259_v60 }
   0x6   :  { %1113 = vmatprep.subr.bf16.mxu1 %v1112_v8  ;;  %v53_v20 = vld [vmem:[%s2088_s1 + $0x110] sm:$0xff]  ;;  %v1116_v21 = vpack.c.bf16 %v70_v19, %v69_v18  ;;  %v54_v22 = vld [vmem:[%s2088_s1 + $0x118] sm:$0xff]  ;;  %v40_v24 = vld [vmem:[%s2088_s1 + $0xa8] sm:$0xff]  ;;  %1085 = vmatprep.subr.bf16.mxu0 %v1084_v16 }
   0x7   :  { %1115 = vmatpush3.bf16.msra.mxu1 %v1114_v12  ;;  %v1118_v25 = vpack.c.bf16 %v54_v22, %v53_v20  ;;  %v1088_v26 = vpack.c.bf16 %v40_v24, %v39_v23  ;;  %v23_v27 = vld [vmem:[%s2088_s1 + $0x20] sm:$0xff]  ;;  %v24_v28 = vld [vmem:[%s2088_s1 + $0x28] sm:$0xff]  ;;  %v41_v35 = vld [vmem:[%s2088_s1 + $0xb0] sm:$0xff] }
   0x8   :  { %v71_v29 = vld [vmem:[%s2088_s1 + $0x1a0] sm:$0xff]  ;;  %1117 = vmatprep.subr.bf16.mxu1 %v1116_v21  ;;  %v72_v30 = vld [vmem:[%s2088_s1 + $0x1a8] sm:$0xff]  ;;  %v1090_v33 = vpack.c.bf16 %v24_v28, %v23_v27  ;;  %v42_v36 = vld [vmem:[%s2088_s1 + $0xb8] sm:$0xff] }
   0x9   :  { %v55_v31 = vld [vmem:[%s2088_s1 + $0x120] sm:$0xff]  ;;  %v56_v32 = vld [vmem:[%s2088_s1 + $0x128] sm:$0xff]  ;;  %1087 = vmatpush3.bf16.msra.mxu0 %v1086_v17  ;;  %v1120_v34 = vpack.c.bf16 %v72_v30, %v71_v29  ;;  %v25_v37 = vld [vmem:[%s2088_s1 + $0x30] sm:$0xff]  ;;  %v1092_v39 = vpack.c.bf16 %v42_v36, %v41_v35 }
   0xa   :  { %1089 = vmatprep.subr.bf16.mxu0 %v1088_v26  ;;  %v1122_v38 = vpack.c.bf16 %v56_v32, %v55_v31  ;;  %v26_v40 = vld [vmem:[%s2088_s1 + $0x38] sm:$0xff]  ;;  %v73_v41 = vld [vmem:[%s2088_s1 + $0x1b0] sm:$0xff]  ;;  %v43_v49 = vld [vmem:[%s2088_s1 + $0xc0] sm:$0xff] }
   0xb   :  { %1119 = vmatpush3.bf16.msra.mxu1 %v1118_v25  ;;  %v74_v42 = vld [vmem:[%s2088_s1 + $0x1b8] sm:$0xff]  ;;  %v57_v47 = vld [vmem:[%s2088_s1 + $0x130] sm:$0xff]  ;;  %v44_v50 = vld [vmem:[%s2088_s1 + $0xc8] sm:$0xff]  ;;  %v1094_v51 = vpack.c.bf16 %v26_v40, %v25_v37 }
   0xc   :  { %1121 = vmatprep.subr.bf16.mxu1 %v1120_v34  ;;  %v1124_v46 = vpack.c.bf16 %v74_v42, %v73_v41  ;;  %v58_v48 = vld [vmem:[%s2088_s1 + $0x138] sm:$0xff]  ;;  %v75_v52 = vld [vmem:[%s2088_s1 + $0x1c0] sm:$0xff]  ;;  %v76_v53 = vld [vmem:[%s2088_s1 + $0x1c8] sm:$0xff]  ;;  %v1096_v55 = vpack.c.bf16 %v44_v50, %v43_v49 }
   0xd   :  { %1091 = vmatpush3.bf16.msra.mxu0 %v1090_v33  ;;  %v1126_v54 = vpack.c.bf16 %v58_v48, %v57_v47  ;;  %v27_v56 = vld [vmem:[%s2088_s1 + $0x40] sm:$0xff]  ;;  %v28_v57 = vld [vmem:[%s2088_s1 + $0x48] sm:$0xff]  ;;  %v1128_v61 = vpack.c.bf16 %v76_v53, %v75_v52  ;;  %v45_v63 = vld [vmem:[%s2088_s1 + $0xd0] sm:$0xff] }
   0xe   :  { %1093 = vmatprep.subr.bf16.mxu0 %v1092_v39  ;;  %v59_v58 = vld [vmem:[%s2088_s1 + $0x140] sm:$0xff]  ;;  %v60_v62 = vld [vmem:[%s2088_s1 + $0x148] sm:$0xff]  ;;  %v46_v0 = vld [vmem:[%s2088_s1 + $0xd8] sm:$0xff]  ;;  %v1098_v3 = vpack.c.bf16 %v28_v57, %v27_v56 }
   0xf   :  { %1123 = vmatpush3.bf16.msra.mxu1 %v1122_v38  ;;  %v77_v1 = vld [vmem:[%s2088_s1 + $0x1d0] sm:$0xff]  ;;  %v78_v2 = vld [vmem:[%s2088_s1 + $0x1d8] sm:$0xff]  ;;  %v1130_v5 = vpack.c.bf16 %v60_v62, %v59_v58  ;;  %v1100_v6 = vpack.c.bf16 %v46_v0, %v45_v63  ;;  %v47_v12 = vld [vmem:[%s2088_s1 + $0xe0] sm:$0xff] }
  0x10   :  { %1125 = vmatprep.subr.bf16.mxu1 %v1124_v46  ;;  %v29_v4 = vld [vmem:[%s2088_s1 + $0x50] sm:$0xff]  ;;  %v30_v7 = vld [vmem:[%s2088_s1 + $0x58] sm:$0xff]  ;;  %v1132_v11 = vpack.c.bf16 %v78_v2, %v77_v1  ;;  %v48_v13 = vld [vmem:[%s2088_s1 + $0xe8] sm:$0xff] }
  0x11   :  { %1095 = vmatpush3.bf16.msra.mxu0 %v1094_v51  ;;  %v61_v8 = vld [vmem:[%s2088_s1 + $0x150] sm:$0xff]  ;;  %v62_v9 = vld [vmem:[%s2088_s1 + $0x158] sm:$0xff]  ;;  %v79_v14 = vld [vmem:[%s2088_s1 + $0x1e0] sm:$0xff]  ;;  %v1102_v16 = vpack.c.bf16 %v30_v7, %v29_v4  ;;  %v1104_v19 = vpack.c.bf16 %v48_v13, %v47_v12 }
  0x12   :  { %1097 = vmatprep.subr.bf16.mxu0 %v1096_v55  ;;  %v80_v15 = vld [vmem:[%s2088_s1 + $0x1e8] sm:$0xff]  ;;  %v1134_v17 = vpack.c.bf16 %v62_v9, %v61_v8  ;;  %v15_v18 = vld [vmem:[%s2087_s0] sm:$0xff]  ;;  %v49_v27 = vld [vmem:[%s2088_s1 + $0xf0] sm:$0xff] }
  0x13   :  { %1127 = vmatpush3.bf16.msra.mxu1 %v1126_v54  ;;  %v31_v20 = vld [vmem:[%s2088_s1 + $0x60] sm:$0xff]  ;;  %v32_v21 = vld [vmem:[%s2088_s1 + $0x68] sm:$0xff]  ;;  %v261_v23 = vrot.slane %v15_v18, %v1499_v10  ;;  %v254_v24 = vcombine.high %v15_v18, %v15_v18  ;;  %v1136_v25 = vpack.c.bf16 %v80_v15, %v79_v14  ;;  %v50_v28 = vld [vmem:[%s2088_s1 + $0xf8] sm:$0xff] }
  0x14   :  { %1129 = vmatprep.subr.bf16.mxu1 %v1128_v61  ;;  %v63_v22 = vld [vmem:[%s2088_s1 + $0x160] sm:$0xff]  ;;  %v64_v26 = vld [vmem:[%s2088_s1 + $0x168] sm:$0xff]  ;;  %v81_v29 = vld [vmem:[%s2088_s1 + $0x1f0] sm:$0xff]  ;;  %v1106_v33 = vpack.c.bf16 %v32_v21, %v31_v20  ;;  %v1108_v35 = vpack.c.bf16 %v50_v28, %v49_v27 }
  0x15   :  { %1099 = vmatpush3.bf16.msra.mxu0 %v1098_v3  ;;  %v82_v30 = vld [vmem:[%s2088_s1 + $0x1f8] sm:$0xff]  ;;  %v269_v31 = vcombine.high %v261_v23, %v261_v23  ;;  %v268_v32 = vrot.slane %v254_v24, %v1499_v10  ;;  %v1138_v34 = vpack.c.bf16 %v64_v26, %v63_v22  ;;  %v33_v36 = vld [vmem:[%s2088_s1 + $0x70] sm:$0xff]  ;;  %v99_v42 = vld [vmem:[%s2088_s1 + $0x280] sm:$0xff] }
  0x16   :  { %1101 = vmatprep.subr.bf16.mxu0 %v1100_v6  ;;  %v34_v37 = vld [vmem:[%s2088_s1 + $0x78] sm:$0xff]  ;;  %v65_v38 = vld [vmem:[%s2088_s1 + $0x170] sm:$0xff]  ;;  %v1140_v40 = vpack.c.bf16 %v82_v30, %v81_v29  ;;  %v100_v43 = vld [vmem:[%s2088_s1 + $0x288] sm:$0xff] }
  0x17   :  { %1131 = vmatpush3.bf16.msra.mxu1 %v1130_v5  ;;  %v270_v39 = vcombine.high %v268_v32, %v268_v32  ;;  %391 = vmatprep.mubr.f32.mxu0 %v269_v31  ;;  %v66_v41 = vld [vmem:[%s2088_s1 + $0x178] sm:$0xff]  ;;  %v131_v44 = vld [vmem:[%s2088_s1 + $0x380] sm:$0xff]  ;;  %v132_v45 = vld [vmem:[%s2088_s1 + $0x388] sm:$0xff]  ;;  %v1110_v46 = vpack.c.bf16 %v34_v37, %v33_v36  ;;  %v1144_v48 = vpack.c.bf16 %v100_v43, %v99_v42 }
  0x18   :  { %1133 = vmatprep.subr.bf16.mxu1 %v1132_v11  ;;  %v1142_v47 = vpack.c.bf16 %v66_v41, %v65_v38  ;;  %v83_v49 = vld [vmem:[%s2088_s1 + $0x200] sm:$0xff]  ;;  %v84_v50 = vld [vmem:[%s2088_s1 + $0x208] sm:$0xff]  ;;  %v1176_v52 = vpack.c.bf16 %v132_v45, %v131_v44  ;;  %v101_v54 = vld [vmem:[%s2088_s1 + $0x290] sm:$0xff] }
  0x19   :  { %1103 = vmatpush3.bf16.msra.mxu0 %v1102_v16  ;;  %461 = vmatprep.mubr.f32.mxu1 %v270_v39  ;;  %v115_v51 = vld [vmem:[%s2088_s1 + $0x300] sm:$0xff]  ;;  %v116_v53 = vld [vmem:[%s2088_s1 + $0x308] sm:$0xff]  ;;  %v102_v55 = vld [vmem:[%s2088_s1 + $0x298] sm:$0xff]  ;;  %v1146_v58 = vpack.c.bf16 %v84_v50, %v83_v49 }
  0x1a   :  { %1105 = vmatprep.subr.bf16.mxu0 %v1104_v19  ;;  %v133_v56 = vld [vmem:[%s2088_s1 + $0x390] sm:$0xff]  ;;  %v134_v57 = vld [vmem:[%s2088_s1 + $0x398] sm:$0xff]  ;;  %v1178_v59 = vpack.c.bf16 %v116_v53, %v115_v51  ;;  %v1148_v60 = vpack.c.bf16 %v102_v55, %v101_v54  ;;  %v103_v2 = vld [vmem:[%s2088_s1 + $0x2a0] sm:$0xff] }
  0x1b   :  { %1135 = vmatpush3.bf16.msra.mxu1 %v1134_v17  ;;  %v85_v61 = vld [vmem:[%s2088_s1 + $0x210] sm:$0xff]  ;;  %v86_v62 = vld [vmem:[%s2088_s1 + $0x218] sm:$0xff]  ;;  %v1180_v0 = vpack.c.bf16 %v134_v57, %v133_v56  ;;  %v104_v3 = vld [vmem:[%s2088_s1 + $0x2a8] sm:$0xff] }
  0x1c   :  { %1137 = vmatprep.subr.bf16.mxu1 %v1136_v25  ;;  %v117_v63 = vld [vmem:[%s2088_s1 + $0x310] sm:$0xff]  ;;  %v118_v1 = vld [vmem:[%s2088_s1 + $0x318] sm:$0xff]  ;;  %v135_v4 = vld [vmem:[%s2088_s1 + $0x3a0] sm:$0xff]  ;;  %v1150_v6 = vpack.c.bf16 %v86_v62, %v85_v61  ;;  %v1152_v8 = vpack.c.bf16 %v104_v3, %v103_v2 }
  0x1d   :  { %1107 = vmatpush3.bf16.msra.mxu0 %v1106_v33  ;;  %v136_v5 = vld [vmem:[%s2088_s1 + $0x3a8] sm:$0xff]  ;;  %v1182_v7 = vpack.c.bf16 %v118_v1, %v117_v63  ;;  %v87_v9 = vld [vmem:[%s2088_s1 + $0x220] sm:$0xff]  ;;  %v105_v15 = vld [vmem:[%s2088_s1 + $0x2b0] sm:$0xff] }
  0x1e   :  { %1109 = vmatprep.subr.bf16.mxu0 %v1108_v35  ;;  %v88_v11 = vld [vmem:[%s2088_s1 + $0x228] sm:$0xff]  ;;  %v119_v12 = vld [vmem:[%s2088_s1 + $0x320] sm:$0xff]  ;;  %v1184_v13 = vpack.c.bf16 %v136_v5, %v135_v4  ;;  %v106_v16 = vld [vmem:[%s2088_s1 + $0x2b8] sm:$0xff] }
  0x1f   :  { %1139 = vmatpush3.bf16.msra.mxu1 %v1138_v34  ;;  %v120_v14 = vld [vmem:[%s2088_s1 + $0x328] sm:$0xff]  ;;  %v137_v17 = vld [vmem:[%s2088_s1 + $0x3b0] sm:$0xff]  ;;  %v138_v18 = vld [vmem:[%s2088_s1 + $0x3b8] sm:$0xff]  ;;  %v1154_v19 = vpack.c.bf16 %v88_v11, %v87_v9  ;;  %v1156_v22 = vpack.c.bf16 %v106_v16, %v105_v15 }
  0x20   :  { %1141 = vmatprep.subr.bf16.mxu1 %v1140_v40  ;;  %v89_v20 = vld [vmem:[%s2088_s1 + $0x230] sm:$0xff]  ;;  %v1186_v21 = vpack.c.bf16 %v120_v14, %v119_v12  ;;  %v122_v25 = vld [vmem:[%s2088_s1 + $0x338] sm:$0xff]  ;;  %v1188_v26 = vpack.c.bf16 %v138_v18, %v137_v17  ;;  %v107_v27 = vld [vmem:[%s2088_s1 + $0x2c0] sm:$0xff] }
  0x21   :  { %1111 = vmatpush3.bf16.msra.mxu0 %v1110_v46  ;;  %v121_v24 = vld [vmem:[%s2088_s1 + $0x330] sm:$0xff]  ;;  %v108_v28 = vld [vmem:[%s2088_s1 + $0x2c8] sm:$0xff]  ;;  %v139_v30 = vld [vmem:[%s2088_s1 + $0x3c0] sm:$0xff] }
  0x22   :  { %1145 = vmatprep.subr.bf16.mxu0 %v1144_v48  ;;  %v16_v29 = vld [vmem:[%s2087_s0 + $0x8] sm:$0xff]  ;;  %v1190_v35 = vpack.c.bf16 %v122_v25, %v121_v24  ;;  %v1160_v36 = vpack.c.bf16 %v108_v28, %v107_v27  ;;  %v91_v37 = vld [vmem:[%s2088_s1 + $0x240] sm:$0xff]  ;;  %v109_v44 = vld [vmem:[%s2088_s1 + $0x2d0] sm:$0xff] }
  0x23   :  { %1143 = vmatpush3.bf16.msra.mxu1 %v1142_v47  ;;  %v140_v31 = vld [vmem:[%s2088_s1 + $0x3c8] sm:$0xff]  ;;  %v271_v33 = vcombine.high %v16_v29, %v16_v29  ;;  %v123_v39 = vld [vmem:[%s2088_s1 + $0x340] sm:$0xff]  ;;  %v110_v45 = vld [vmem:[%s2088_s1 + $0x2d8] sm:$0xff] }
  0x24   :  { %1177 = vmatprep.subr.bf16.mxu1 %v1176_v52  ;;  %392 = vmatmul.mubr.f32.vlgmr.msra.gmra.mrb[0].mxu0 %v261_v23  ;;  %v90_v23 = vld [vmem:[%s2088_s1 + $0x238] sm:$0xff]  ;;  %v92_v38 = vld [vmem:[%s2088_s1 + $0x248] sm:$0xff]  ;;  %v1192_v42 = vpack.c.bf16 %v140_v31, %v139_v30  ;;  %v141_v46 = vld [vmem:[%s2088_s1 + $0x3d0] sm:$0xff]  ;;  %v1164_v51 = vpack.c.bf16 %v110_v45, %v109_v44 }
  0x25   :  { %1147 = vmatpush3.bf16.msra.mxu0 %v1146_v58  ;;  %v1158_v34 = vpack.c.bf16 %v90_v23, %v89_v20  ;;  %v1680_v41 = vrot.slane %v271_v33, %v1499_v10  ;;  %v124_v43 = vld [vmem:[%s2088_s1 + $0x348] sm:$0xff]  ;;  %v142_v47 = vld [vmem:[%s2088_s1 + $0x3d8] sm:$0xff]  ;;  %v1162_v49 = vpack.c.bf16 %v92_v38, %v91_v37  ;;  %v93_v52 = vld [vmem:[%s2088_s1 + $0x250] sm:$0xff] }
  0x26   :  { %462 = vmatmul.mubr.f32.vlgmr.msra.gmra.mrb[0].mxu1 %v268_v32  ;;  %1149 = vmatprep.subr.bf16.mxu0 %v1148_v60  ;;  %v1666_v32 = vrot.slane %v16_v29, %v1499_v10  ;;  %v1194_v50 = vpack.c.bf16 %v124_v43, %v123_v39  ;;  %v94_v53 = vld [vmem:[%s2088_s1 + $0x258] sm:$0xff]  ;;  %v125_v54 = vld [vmem:[%s2088_s1 + $0x350] sm:$0xff]  ;;  %v1196_v55 = vpack.c.bf16 %v142_v47, %v141_v46  ;;  %v111_v57 = vld [vmem:[%s2088_s1 + $0x2e0] sm:$0xff] }
  0x27   :  { %1179 = vmatpush3.bf16.msra.mxu1 %v1178_v59  ;;  %v287_v48 = vcombine.high %v1680_v41, %v1680_v41  ;;  %v126_v56 = vld [vmem:[%s2088_s1 + $0x358] sm:$0xff]  ;;  %v112_v58 = vld [vmem:[%s2088_s1 + $0x2e8] sm:$0xff]  ;;  %v143_v59 = vld [vmem:[%s2088_s1 + $0x3e0] sm:$0xff]  ;;  %v1166_v61 = vpack.c.bf16 %v94_v53, %v93_v52 }
  0x28   :  { %1181 = vmatprep.subr.bf16.mxu1 %v1180_v0  ;;  %v286_v40 = vcombine.high %v1666_v32, %v1666_v32  ;;  %v144_v60 = vld [vmem:[%s2088_s1 + $0x3e8] sm:$0xff]  ;;  %v1198_v62 = vpack.c.bf16 %v126_v56, %v125_v54  ;;  %v1168_v63 = vpack.c.bf16 %v112_v58, %v111_v57  ;;  %v95_v0 = vld [vmem:[%s2088_s1 + $0x260] sm:$0xff]  ;;  %v113_v5 = vld [vmem:[%s2088_s1 + $0x2f0] sm:$0xff] }
  0x29   :  { %1151 = vmatpush3.bf16.msra.mxu0 %v1150_v6  ;;  %601 = vmatprep.mubr.f32.mxu1 %v287_v48  ;;  %v96_v1 = vld [vmem:[%s2088_s1 + $0x268] sm:$0xff]  ;;  %v127_v2 = vld [vmem:[%s2088_s1 + $0x360] sm:$0xff]  ;;  %v1200_v3 = vpack.c.bf16 %v144_v60, %v143_v59  ;;  %v114_v6 = vld [vmem:[%s2088_s1 + $0x2f8] sm:$0xff] }
  0x2a   :  { %1153 = vmatprep.subr.bf16.mxu0 %v1152_v8  ;;  %531 = vmatprep.mubr.f32.mxu0 %v286_v40  ;;  %v128_v4 = vld [vmem:[%s2088_s1 + $0x368] sm:$0xff]  ;;  %v146_v8 = vld [vmem:[%s2088_s1 + $0x3f8] sm:$0xff]  ;;  %v1170_v9 = vpack.c.bf16 %v96_v1, %v95_v0  ;;  %v1172_v12 = vpack.c.bf16 %v114_v6, %v113_v5  ;;  %v129_v15 = vld [vmem:[%s2088_s1 + $0x370] sm:$0xff] }
  0x2b   :  { %1183 = vmatpush3.bf16.msra.mxu1 %v1182_v7  ;;  %v145_v7 = vld [vmem:[%s2088_s1 + $0x3f0] sm:$0xff]  ;;  %v1202_v11 = vpack.c.bf16 %v128_v4, %v127_v2  ;;  %v98_v14 = vld [vmem:[%s2088_s1 + $0x278] sm:$0xff]  ;;  %v163_v18 = vld [vmem:[%s2088_s1 + $0x480] sm:$0xff] }
  0x2c   :  { %1185 = vmatprep.subr.bf16.mxu1 %v1184_v13  ;;  %v97_v13 = vld [vmem:[%s2088_s1 + $0x270] sm:$0xff]  ;;  %v1204_v16 = vpack.c.bf16 %v146_v8, %v145_v7  ;;  %v130_v17 = vld [vmem:[%s2088_s1 + $0x378] sm:$0xff]  ;;  %v195_v20 = vld [vmem:[%s2088_s1 + $0x580] sm:$0xff] }
  0x2d   :  { %1155 = vmatpush3.bf16.msra.mxu0 %v1154_v19  ;;  %v164_v19 = vld [vmem:[%s2088_s1 + $0x488] sm:$0xff]  ;;  %v147_v23 = vld [vmem:[%s2088_s1 + $0x400] sm:$0xff]  ;;  %v1206_v24 = vpack.c.bf16 %v130_v17, %v129_v15  ;;  %v165_v30 = vld [vmem:[%s2088_s1 + $0x490] sm:$0xff] }
  0x2e   :  { %1157 = vmatprep.subr.bf16.mxu0 %v1156_v22  ;;  %v1174_v22 = vpack.c.bf16 %v98_v14, %v97_v13  ;;  %v1208_v25 = vpack.c.bf16 %v164_v19, %v163_v18  ;;  %v179_v27 = vld [vmem:[%s2088_s1 + $0x500] sm:$0xff]  ;;  %v180_v28 = vld [vmem:[%s2088_s1 + $0x508] sm:$0xff]  ;;  %v166_v31 = vld [vmem:[%s2088_s1 + $0x498] sm:$0xff] }
  0x2f   :  { %1187 = vmatpush3.bf16.msra.mxu1 %v1186_v21  ;;  %v196_v21 = vld [vmem:[%s2088_s1 + $0x588] sm:$0xff]  ;;  %v197_v33 = vld [vmem:[%s2088_s1 + $0x590] sm:$0xff]  ;;  %v1212_v38 = vpack.c.bf16 %v166_v31, %v165_v30  ;;  %v150_v40 = vld [vmem:[%s2088_s1 + $0x418] sm:$0xff] }
  0x30   :  { %1189 = vmatprep.subr.bf16.mxu1 %v1188_v26  ;;  %v148_v26 = vld [vmem:[%s2088_s1 + $0x408] sm:$0xff]  ;;  %v1240_v29 = vpack.c.bf16 %v196_v21, %v195_v20  ;;  %v17_v37 = vld [vmem:[%s2087_s0 + $0x10] sm:$0xff]  ;;  %v182_v46 = vld [vmem:[%s2088_s1 + $0x518] sm:$0xff] }
  0x31   :  { %1159 = vmatpush3.bf16.msra.mxu0 %v1158_v34  ;;  %v198_v34 = vld [vmem:[%s2088_s1 + $0x598] sm:$0xff]  ;;  %v149_v39 = vld [vmem:[%s2088_s1 + $0x410] sm:$0xff]  ;;  %v1808_v43 = vrot.slane %v17_v37, %v1499_v10  ;;  %v288_v44 = vcombine.high %v17_v37, %v17_v37  ;;  %v167_v47 = vld [vmem:[%s2088_s1 + $0x4a0] sm:$0xff] }
  0x32   :  { %1161 = vmatprep.subr.bf16.mxu0 %v1160_v36  ;;  %v1242_v36 = vpack.c.bf16 %v180_v28, %v179_v27  ;;  %v1244_v45 = vpack.c.bf16 %v198_v34, %v197_v33  ;;  %v168_v48 = vld [vmem:[%s2088_s1 + $0x4a8] sm:$0xff]  ;;  %v1214_v53 = vpack.c.bf16 %v150_v40, %v149_v39  ;;  %v169_v59 = vld [vmem:[%s2088_s1 + $0x4b0] sm:$0xff]  ;;  %v170_v60 = vld [vmem:[%s2088_s1 + $0x4b8] sm:$0xff] }
  0x33   :  { %1191 = vmatpush3.bf16.msra.mxu1 %v1190_v35  ;;  %v1210_v35 = vpack.c.bf16 %v148_v26, %v147_v23  ;;  %v1829_v52 = vrot.slane %v288_v44, %v1499_v10  ;;  %v1216_v54 = vpack.c.bf16 %v168_v48, %v167_v47  ;;  %v152_v56 = vld [vmem:[%s2088_s1 + $0x428] sm:$0xff]  ;;  %v183_v10 = vld [vmem:[%s2088_s1 + $0x520] sm:$0xff]  ;;  %v1220_v1 = vpack.c.bf16 %v170_v60, %v169_v59  ;;  %v153_v2 = vld [vmem:[%s2088_s1 + $0x430] sm:$0xff] }
  0x34   :  { %1193 = vmatprep.subr.bf16.mxu1 %v1192_v42  ;;  %v181_v42 = vld [vmem:[%s2088_s1 + $0x510] sm:$0xff]  ;;  %v184_v58 = vld [vmem:[%s2088_s1 + $0x528] sm:$0xff]  ;;  %v186_v6 = vld [vmem:[%s2088_s1 + $0x538] sm:$0xff] }
  0x35   :  { %1163 = vmatpush3.bf16.msra.mxu0 %v1162_v49  ;;  %v199_v49 = vld [vmem:[%s2088_s1 + $0x5a0] sm:$0xff]  ;;  %v1250_v0 = vpack.c.bf16 %v184_v58, %v183_v10  ;;  %v185_v4 = vld [vmem:[%s2088_s1 + $0x530] sm:$0xff]  ;;  %v172_v8 = vld [vmem:[%s2088_s1 + $0x4c8] sm:$0xff] }
  0x36   :  { %1165 = vmatprep.subr.bf16.mxu0 %v1164_v51  ;;  %v303_v51 = vcombine.high %v1808_v43, %v1808_v43  ;;  %v171_v7 = vld [vmem:[%s2088_s1 + $0x4c0] sm:$0xff] }
  0x37   :  { %1195 = vmatpush3.bf16.msra.mxu1 %v1194_v50  ;;  %v200_v50 = vld [vmem:[%s2088_s1 + $0x5a8] sm:$0xff] }
  0x38   :  { %1197 = vmatprep.subr.bf16.mxu1 %v1196_v55  ;;  %v151_v55 = vld [vmem:[%s2088_s1 + $0x420] sm:$0xff]  ;;  %v1248_v57 = vpack.c.bf16 %v200_v50, %v199_v49 }
  0x39   :  { %1167 = vmatpush3.bf16.msra.mxu0 %v1166_v61  ;;  %v201_v61 = vld [vmem:[%s2088_s1 + $0x5b0] sm:$0xff] }
  0x3a   :  { %1169 = vmatprep.subr.bf16.mxu0 %v1168_v63  ;;  %v1218_v63 = vpack.c.bf16 %v152_v56, %v151_v55 }
  0x3b   :  { %1199 = vmatpush3.bf16.msra.mxu1 %v1198_v62  ;;  %v202_v62 = vld [vmem:[%s2088_s1 + $0x5b8] sm:$0xff] }
  0x3c   :  { %1201 = vmatprep.subr.bf16.mxu1 %v1200_v3  ;;  %v154_v3 = vld [vmem:[%s2088_s1 + $0x438] sm:$0xff]  ;;  %v1252_v5 = vpack.c.bf16 %v202_v62, %v201_v61 }
  0x3d   :  { %1171 = vmatpush3.bf16.msra.mxu0 %v1170_v9  ;;  %v203_v9 = vld [vmem:[%s2088_s1 + $0x5c0] sm:$0xff] }
  0x3e   :  { %1173 = vmatprep.subr.bf16.mxu0 %v1172_v12  ;;  %v1222_v12 = vpack.c.bf16 %v154_v3, %v153_v2 }
  0x3f   :  { %1203 = vmatpush3.bf16.msra.mxu1 %v1202_v11  ;;  %v204_v11 = vld [vmem:[%s2088_s1 + $0x5c8] sm:$0xff] }
  0x40   :  { %1205 = vmatprep.subr.bf16.mxu1 %v1204_v16 }
  0x41   :  { %1175 = vmatpush3.bf16.msra.mxu0 %v1174_v22 }
  0x42   :  { %1209 = vmatprep.subr.bf16.mxu0 %v1208_v25 }
  0x43   :  { %1207 = vmatpush3.bf16.msra.mxu1 %v1206_v24 }
  0x44   :  { %1241 = vmatprep.subr.bf16.mxu1 %v1240_v29  ;;  %532 = vmatmul.mubr.f32.vlgmr.msra.gmra.mrb[2].mxu0 %v1666_v32  ;;  %v1246_v32 = vpack.c.bf16 %v182_v46, %v181_v42 }
  0x45   :  { %1211 = vmatpush3.bf16.msra.mxu0 %v1210_v35  ;;  %671 = vmatprep.mubr.f32.mxu0 %v303_v51 }
  0x46   :  { %602 = vmatmul.mubr.f32.vlgmr.msra.gmra.mrb[2].mxu1 %v1680_v41  ;;  %1213 = vmatprep.subr.bf16.mxu0 %v1212_v38  ;;  %v304_v41 = vcombine.high %v1829_v52, %v1829_v52 }
  0x47   :  { %1243 = vmatpush3.bf16.msra.mxu1 %v1242_v36 }
  0x48   :  { %1245 = vmatprep.subr.bf16.mxu1 %v1244_v45  ;;  %741 = vmatprep.mubr.f32.mxu1 %v304_v41 }
  0x49   :  { %1215 = vmatpush3.bf16.msra.mxu0 %v1214_v53 }
  0x4a   :  { %1217 = vmatprep.subr.bf16.mxu0 %v1216_v54 }
  0x4b   :  { %1247 = vmatpush3.bf16.msra.mxu1 %v1246_v32 }
  0x4c   :  { %1249 = vmatprep.subr.bf16.mxu1 %v1248_v57 }
  0x4d   :  { %1219 = vmatpush3.bf16.msra.mxu0 %v1218_v63 }
  0x4e   :  { %8 = vsyncpa [#allocation3], 0  ;;  %1221 = vmatprep.subr.bf16.mxu0 %v1220_v1  ;;  %v1254_v13 = vpack.c.bf16 %v186_v6, %v185_v4  ;;  %v1224_v14 = vpack.c.bf16 %v172_v8, %v171_v7  ;;  %v155_v15 = vld [vmem:[%s2088_s1 + $0x440] sm:$0xff]  ;;  %v156_v16 = vld [vmem:[%s2088_s1 + $0x448] sm:$0xff]  ;;  %v1256_v18 = vpack.c.bf16 %v204_v11, %v203_v9  ;;  %vm817_vm0 = vcmask 9216  }
  0x4f   :  { %1251 = vmatpush3.bf16.msra.mxu1 %v1250_v0  ;;  %v187_v17 = vld [vmem:[%s2088_s1 + $0x540] sm:$0xff]  ;;  %v188_v19 = vld [vmem:[%s2088_s1 + $0x548] sm:$0xff]  ;;  %v173_v20 = vld [vmem:[%s2088_s1 + $0x4d0] sm:$0xff]  ;;  %v1226_v24 = vpack.c.bf16 %v156_v16, %v155_v15 }
  0x50   :  { %1253 = vmatprep.subr.bf16.mxu1 %v1252_v5  ;;  %v174_v21 = vld [vmem:[%s2088_s1 + $0x4d8] sm:$0xff]  ;;  %v205_v22 = vld [vmem:[%s2088_s1 + $0x5d0] sm:$0xff]  ;;  %v1258_v25 = vpack.c.bf16 %v188_v19, %v187_v17  ;;  %v175_v33 = vld [vmem:[%s2088_s1 + $0x4e0] sm:$0xff] }
  0x51   :  { %v206_v23 = vld [vmem:[%s2088_s1 + $0x5d8] sm:$0xff]  ;;  %1223 = vmatpush3.bf16.msra.mxu0 %v1222_v12  ;;  %v1228_v26 = vpack.c.bf16 %v174_v21, %v173_v20  ;;  %v157_v27 = vld [vmem:[%s2088_s1 + $0x450] sm:$0xff]  ;;  %v176_v34 = vld [vmem:[%s2088_s1 + $0x4e8] sm:$0xff] }
  0x52   :  { %1225 = vmatprep.subr.bf16.mxu0 %v1224_v14  ;;  %v158_v28 = vld [vmem:[%s2088_s1 + $0x458] sm:$0xff]  ;;  %v189_v29 = vld [vmem:[%s2088_s1 + $0x550] sm:$0xff]  ;;  %v1260_v30 = vpack.c.bf16 %v206_v23, %v205_v22  ;;  %v207_v35 = vld [vmem:[%s2088_s1 + $0x5e0] sm:$0xff]  ;;  %v1232_v39 = vpack.c.bf16 %v176_v34, %v175_v33 }
  0x53   :  { %1255 = vmatpush3.bf16.msra.mxu1 %v1254_v13  ;;  %v190_v31 = vld [vmem:[%s2088_s1 + $0x558] sm:$0xff]  ;;  %v208_v36 = vld [vmem:[%s2088_s1 + $0x5e8] sm:$0xff]  ;;  %v1230_v37 = vpack.c.bf16 %v158_v28, %v157_v27  ;;  %v159_v40 = vld [vmem:[%s2088_s1 + $0x460] sm:$0xff] }
  0x54   :  { %1257 = vmatprep.subr.bf16.mxu1 %v1256_v18  ;;  %v1262_v38 = vpack.c.bf16 %v190_v31, %v189_v29  ;;  %v160_v42 = vld [vmem:[%s2088_s1 + $0x468] sm:$0xff]  ;;  %v191_v44 = vld [vmem:[%s2088_s1 + $0x560] sm:$0xff]  ;;  %v1264_v45 = vpack.c.bf16 %v208_v36, %v207_v35  ;;  %v177_v47 = vld [vmem:[%s2088_s1 + $0x4f0] sm:$0xff] }
  0x55   :  { %1227 = vmatpush3.bf16.msra.mxu0 %v1226_v24  ;;  %v192_v46 = vld [vmem:[%s2088_s1 + $0x568] sm:$0xff]  ;;  %v178_v48 = vld [vmem:[%s2088_s1 + $0x4f8] sm:$0xff]  ;;  %v209_v49 = vld [vmem:[%s2088_s1 + $0x5f0] sm:$0xff]  ;;  %v1234_v51 = vpack.c.bf16 %v160_v42, %v159_v40 }
  0x56   :  { %1229 = vmatprep.subr.bf16.mxu0 %v1228_v26  ;;  %v210_v50 = vld [vmem:[%s2088_s1 + $0x5f8] sm:$0xff]  ;;  %v1266_v53 = vpack.c.bf16 %v192_v46, %v191_v44  ;;  %v1236_v32 = vpack.c.bf16 %v178_v48, %v177_v47  ;;  %v161_v54 = vld [vmem:[%s2088_s1 + $0x470] sm:$0xff]  ;;  %v227_v57 = vld [vmem:[%s2088_s1 + $0x680] sm:$0xff] }
  0x57   :  { %1259 = vmatpush3.bf16.msra.mxu1 %v1258_v25  ;;  %v162_v55 = vld [vmem:[%s2088_s1 + $0x478] sm:$0xff]  ;;  %v193_v56 = vld [vmem:[%s2088_s1 + $0x570] sm:$0xff]  ;;  %v1268_v10 = vpack.c.bf16 %v210_v50, %v209_v49  ;;  %v228_v58 = vld [vmem:[%s2088_s1 + $0x688] sm:$0xff] }
  0x58   :  { %1261 = vmatprep.subr.bf16.mxu1 %v1260_v30  ;;  %v194_v41 = vld [vmem:[%s2088_s1 + $0x578] sm:$0xff]  ;;  %v1238_v59 = vpack.c.bf16 %v162_v55, %v161_v54  ;;  %v1272_v61 = vpack.c.bf16 %v228_v58, %v227_v57  ;;  %v211_v62 = vld [vmem:[%s2088_s1 + $0x600] sm:$0xff]  ;;  %v212_v63 = vld [vmem:[%s2088_s1 + $0x608] sm:$0xff] }
  0x59   :  { %1231 = vmatpush3.bf16.msra.mxu0 %v1230_v37  ;;  %v1270_v60 = vpack.c.bf16 %v194_v41, %v193_v56  ;;  %v229_v0 = vld [vmem:[%s2088_s1 + $0x690] sm:$0xff]  ;;  %v230_v1 = vld [vmem:[%s2088_s1 + $0x698] sm:$0xff]  ;;  %v1274_v3 = vpack.c.bf16 %v212_v63, %v211_v62  ;;  %v231_v8 = vld [vmem:[%s2088_s1 + $0x6a0] sm:$0xff] }
  0x5a   :  { %1233 = vmatprep.subr.bf16.mxu0 %v1232_v39  ;;  %v1987_v2 = vld.sshfl [vmem:[%s2087_s0 + $0x18] sm:$0x33 pattern:$0x76325410]  ;;  %v1276_v4 = vpack.c.bf16 %v230_v1, %v229_v0  ;;  %v213_v5 = vld [vmem:[%s2088_s1 + $0x610] sm:$0xff]  ;;  %v232_v9 = vld [vmem:[%s2088_s1 + $0x6a8] sm:$0xff] }
  0x5b   :  { %1263 = vmatpush3.bf16.msra.mxu1 %v1262_v38  ;;  %v214_v6 = vld [vmem:[%s2088_s1 + $0x618] sm:$0xff]  ;;  %v312_v7 = vcombine.high %v1987_v2, %v1987_v2  ;;  %v1280_v12 = vpack.c.bf16 %v232_v9, %v231_v8  ;;  %v215_v13 = vld [vmem:[%s2088_s1 + $0x620] sm:$0xff]  ;;  %v216_v14 = vld [vmem:[%s2088_s1 + $0x628] sm:$0xff] }
  0x5c   :  { %1265 = vmatprep.subr.bf16.mxu1 %v1264_v45  ;;  %v1278_v11 = vpack.c.bf16 %v214_v6, %v213_v5  ;;  %v233_v15 = vld [vmem:[%s2088_s1 + $0x6b0] sm:$0xff]  ;;  %v218_v18 = vld [vmem:[%s2088_s1 + $0x638] sm:$0xff]  ;;  %v235_v19 = vld [vmem:[%s2088_s1 + $0x6c0] sm:$0xff] }
  0x5d   :  { %1235 = vmatpush3.bf16.msra.mxu0 %v1234_v51  ;;  %v217_v17 = vld [vmem:[%s2088_s1 + $0x630] sm:$0xff]  ;;  %v236_v20 = vld [vmem:[%s2088_s1 + $0x6c8] sm:$0xff]  ;;  %v219_v23 = vld [vmem:[%s2088_s1 + $0x640] sm:$0xff] }
  0x5e   :  { %1237 = vmatprep.subr.bf16.mxu0 %v1236_v32  ;;  %v1286_v21 = vpack.c.bf16 %v218_v18, %v217_v17  ;;  %v1288_v22 = vpack.c.bf16 %v236_v20, %v235_v19  ;;  %v220_v24 = vld [vmem:[%s2088_s1 + $0x648] sm:$0xff]  ;;  %v237_v25 = vld [vmem:[%s2088_s1 + $0x6d0] sm:$0xff]  ;;  %v238_v26 = vld [vmem:[%s2088_s1 + $0x6d8] sm:$0xff] }
  0x5f   :  { %1267 = vmatpush3.bf16.msra.mxu1 %v1266_v53  ;;  %v1290_v27 = vpack.c.bf16 %v220_v24, %v219_v23  ;;  %v1292_v28 = vpack.c.bf16 %v238_v26, %v237_v25  ;;  %v221_v29 = vld [vmem:[%s2088_s1 + $0x650] sm:$0xff]  ;;  %v222_v30 = vld [vmem:[%s2088_s1 + $0x658] sm:$0xff]  ;;  %v239_v31 = vld [vmem:[%s2088_s1 + $0x6e0] sm:$0xff] }
  0x60   :  { %1269 = vmatprep.subr.bf16.mxu1 %v1268_v10  ;;  %v240_v33 = vld [vmem:[%s2088_s1 + $0x6e8] sm:$0xff]  ;;  %v1294_v34 = vpack.c.bf16 %v222_v30, %v221_v29  ;;  %v223_v36 = vld [vmem:[%s2088_s1 + $0x660] sm:$0xff]  ;;  %v241_v38 = vld [vmem:[%s2088_s1 + $0x6f0] sm:$0xff] }
  0x61   :  { %1239 = vmatpush3.bf16.msra.mxu0 %v1238_v59  ;;  %v1296_v35 = vpack.c.bf16 %v240_v33, %v239_v31  ;;  %v224_v37 = vld [vmem:[%s2088_s1 + $0x668] sm:$0xff]  ;;  %v242_v39 = vld [vmem:[%s2088_s1 + $0x6f8] sm:$0xff]  ;;  %v225_v44 = vld [vmem:[%s2088_s1 + $0x670] sm:$0xff] }
  0x62   :  { %1273 = vmatprep.subr.bf16.mxu0 %v1272_v61  ;;  %v1298_v40 = vpack.c.bf16 %v224_v37, %v223_v36  ;;  %v1300_v42 = vpack.c.bf16 %v242_v39, %v241_v38  ;;  %v226_v45 = vld [vmem:[%s2088_s1 + $0x678] sm:$0xff]  ;;  %v833_v48 = vld [vmem:[%s2089_s2] ss:$0 sm:$0xff] }
  0x63   :  { %1271 = vmatpush3.bf16.msra.mxu1 %v1270_v60  ;;  %v1302_v46 = vpack.c.bf16 %v226_v45, %v225_v44 }
  0x64   :  { %672 = vmatmul.mubr.f32.vlgmr.msra.gmra.mrb[4].mxu0 %v1808_v43  ;;  %v234_v43 = vld [vmem:[%s2088_s1 + $0x6b8] sm:$0xff]  ;;  %s1334_s1 = smov [#allocation2]  }
  0x65   :  { %1275 = vmatpush3.bf16.msra.mxu0 %v1274_v3  ;;  %811 = vmatprep.mubr.f32.mxu0 %v312_v7  ;;  %v1284_v16 = vpack.c.bf16 %v234_v43, %v233_v15  ;;  %s825_s2 = sshll.u32 %s1334_s1, 4  ;;  %s826_s2 = int_to_ptr.vmem [resolvable:$true] %s825_s2 }
  0x66   :  { %742 = vmatmul.mubr.f32.vlgmr.msra.gmra.mrb[4].mxu1 %v1829_v52  ;;  %1277 = vmatprep.subr.bf16.mxu0 %v1276_v4  ;;  %v1282_v52 = vpack.c.bf16 %v216_v14, %v215_v13  ;;  %s1309_s9 = scalar_lea.vmem %s826_s2, 32  ;;  %p1314_p1 = scmp.lt.s32.totalorder %s826_s2, %s826_s2 }
  0x67   :  { %p1310_p0 = scmp.ne.s32.totalorder %s826_s2, %s1309_s9  ;;  %p1315_p2 = scmp.lt.s32.totalorder %s1309_s9, %s1309_s9 }
  0x69   :  { %1279 = vmatpush3.bf16.msra.mxu0 %v1278_v11  ;;  %p1316_p3 = por %p1315_p2, %p1314_p1 }
  0x6a   :  { %1281 = vmatprep.subr.bf16.mxu0 %v1280_v12 }
  0x6b   :  { %p1317_p4 = pnand %p1316_p3, %p1310_p0 }
  0x6d   :  { %1283 = vmatpush3.bf16.msra.mxu0 %v1282_v52 }
  0x6e   :  { %1285 = vmatprep.subr.bf16.mxu0 %v1284_v16 }
  0x71   :  { %1287 = vmatpush3.bf16.msra.mxu0 %v1286_v21 }
  0x72   :  { %1289 = vmatprep.subr.bf16.mxu0 %v1288_v22 }
  0x75   :  { %1291 = vmatpush3.bf16.msra.mxu0 %v1290_v27 }
  0x76   :  { %1293 = vmatprep.subr.bf16.mxu0 %v1292_v28 }
  0x79   :  { %1295 = vmatpush3.bf16.msra.mxu0 %v1294_v34 }
  0x7a   :  { %1297 = vmatprep.subr.bf16.mxu0 %v1296_v35 }
  0x7d   :  { %1299 = vmatpush3.bf16.msra.mxu0 %v1298_v40 }
  0x7e   :  { %1301 = vmatprep.subr.bf16.mxu0 %v1300_v42 }
  0x81   :  { %1303 = vmatpush3.bf16.msra.mxu0 %v1302_v46 }
  0x84   :  { %812 = vmatmul.mubr.f32.vlgmr.msra.gmra.mrb[6].mxu0 %v1987_v2 }
  0xf7   :  { %v867_v47 = vpop.f32.mrb[0].mxu0 }
  0xf8   :  { %v868_v49 = vpop.f32.mrb[1].mxu0 }
  0xf9   :  { %v902_v50 = vpop.f32.mrb[0].mxu1  ;;  %v869_v51 = vadd.f32 %v868_v49, %v867_v47 }
  0xfa   :  { %v903_v53 = vpop.f32.mrb[1].mxu1 }
  0xfb   :  { %v904_v32 = vadd.f32 %v903_v53, %v902_v50  ;;  %v394_v54 = vadd.f32 %v869_v51, %v833_v48 }
  0xfd   :  { %v464_v55 = vadd.f32 %v904_v32, %v394_v54 }
 0x117   :  { %v937_v56 = vpop.f32.mrb[2].mxu0 }
 0x118   :  { %v938_v10 = vpop.f32.mrb[3].mxu0 }
 0x119   :  { %v972_v41 = vpop.f32.mrb[2].mxu1  ;;  %v939_v57 = vadd.f32 %v938_v10, %v937_v56 }
 0x11a   :  { %v973_v58 = vpop.f32.mrb[3].mxu1 }
 0x11b   :  { %v974_v59 = vadd.f32 %v973_v58, %v972_v41  ;;  %v534_v60 = vadd.f32 %v939_v57, %v464_v55 }
 0x11d   :  { %v604_v61 = vadd.f32 %v974_v59, %v534_v60 }
 0x137   :  { %v1007_v62 = vpop.f32.mrb[4].mxu0 }
 0x138   :  { %v1008_v63 = vpop.f32.mrb[5].mxu0 }
 0x139   :  { %v1042_v0 = vpop.f32.mrb[4].mxu1  ;;  %v1009_v1 = vadd.f32 %v1008_v63, %v1007_v62 }
 0x13a   :  { %v1043_v2 = vpop.f32.mrb[5].mxu1 }
 0x13b   :  { %v1044_v3 = vadd.f32 %v1043_v2, %v1042_v0  ;;  %v674_v4 = vadd.f32 %v1009_v1, %v604_v61 }
 0x13d   :  { %v744_v5 = vadd.f32 %v1044_v3, %v674_v4 }
 0x157   :  { %v1077_v6 = vpop.f32.mrb[6].mxu0 }
 0x158   :  { %v1078_v7 = vpop.f32.mrb[7].mxu0 }
 0x159   :  { %v1079_v8 = vadd.f32 %v1078_v7, %v1077_v6 }
 0x15b   :  { %v814_v9 = vadd.f32 %v1079_v8, %v744_v5 }
 0x15d   :  { %818 = vst.msk [vmem:[#allocation2] sm:$0x3] %vm817_vm0, %v814_v9 }
 0x15e   :  { %1320 = shalt.err (!%p1317_p4)
}
 0x15f   :  { %s1321_s12 = scalar_lea.hbm %s2090_s3, 32 }
 0x160   :  { %p1322_p5 = scmp.ne.s32.totalorder %s2090_s3, %s1321_s12  ;;  %p1325_p6 = scmp.lt.u32.totalorder %s1321_s12, %s2090_s3 }
 0x162   :  { %p1327_p7 = pnand %p1325_p6, %p1322_p5 }
 0x164   :  { %1330 = shalt.err (!%p1327_p7)
}
 0x165   :  { %828 = dma.vmem_to_hbm [thread:$0]  %s826_s2, 32, %s2090_s3, [#allocation3]  }
 0x166   :  { %1331 = dma.done.wait [#allocation3], 32  }
 0x167   :  { %1332 = vsyncadd [#allocation3], 4294967264 }
 0x168   :  { %832 = vsyncpa [#allocation3], 1 }

</bundles_post_ra>
